<compile_context>
chip_gen: v7x
topology: tpu7x:2x2x1
jax: 0.10.0
libtpu: 0.0.40
codegen_flags: <defaults>
</compile_context>

<pallas_src>
import jax
import jax.numpy as jnp
import numpy as np
from jax.experimental import pallas as pl
from jax.experimental.pallas import tpu as pltpu

EMBEDDING_SIZE = 200  # fixed by the PyTorch module
_LANE = 128


def cbow_kernel(s_ref, w_ref, b_ref, out_ref):
    # s_ref:   (B, E)         context-summed embeddings (resident across tiles)
    # w_ref:   (E, TV)        vocab tile of the transposed linear weight
    # b_ref:   (n_tiles, TV)  full bias, resident; one row per vocab tile
    # out_ref: (B, TV)        vocab tile of the logits (f32)
    j = pl.program_id(0)
    logits = jnp.dot(s_ref[...], w_ref[...], preferred_element_type=jnp.float32)
    bias_tile = b_ref[pl.ds(j, 1), :]                  # (1, TV), dynamic sublane slice
    out_ref[...] = logits + bias_tile.astype(jnp.float32)


def _round_up(x, m):
    return ((x + m - 1) // m) * m


def _choose_tile_v(V, *, max_tile=8192, min_steps=4):
    """Lane-dense vocab tiling. Returns (tile_v, V_padded, num_tiles)."""
    V128 = _round_up(V, _LANE)
    tile = min(max_tile, V128)
    # Keep >= min_steps grid steps when the vocab supports it, so the pipeline
    # actually overlaps DMA and compute (>= 2 steps per TC on v7x's two cores).
    if V128 > min_steps * _LANE:
        tile = min(tile, _round_up(pl.cdiv(V128, min_steps), _LANE))
    tile = max(tile, _LANE)
    V_pad = _round_up(V128, tile)
    return tile, V_pad, V_pad // tile


def cbow_forward(x_idx, emb_table, w_t, bias, *, tile_v=None,
                 compute_dtype=jnp.bfloat16):
    """CBOW forward: logits = (sum_ctx Emb[x]) @ W^T + b.

    x_idx: (B, C) int32; emb_table: (V, E) f32; w_t: (E, V) [= linear.weight.T];
    bias: (V,) f32. Returns (B, V) f32 logits.
    """
    B, C = x_idx.shape
    V, E = emb_table.shape
    assert w_t.shape == (E, V) and bias.shape == (V,)

    # Embedding lookup + context sum hoisted out of the kernel (one fused XLA
    # gather+reduce; grid-invariant). Sum in f32, then cast for streaming.
    summed = jnp.sum(emb_table[x_idx], axis=1)                  # (B, E) f32
    summed = summed.astype(compute_dtype)
    w_c = w_t.astype(compute_dtype)

    if tile_v is None:
        tile_v, V_pad, num_tiles = _choose_tile_v(V)
    else:
        assert tile_v % _LANE == 0
        V_pad = _round_up(V, tile_v)
        num_tiles = V_pad // tile_v

    pad = V_pad - V
    if pad:
        w_c = jnp.pad(w_c, ((0, 0), (0, pad)))
        bias = jnp.pad(bias, ((0, pad),))
    bias_tiles = bias.astype(jnp.float32).reshape(num_tiles, tile_v)

    dsize = jnp.dtype(compute_dtype).itemsize
    # Double-buffered weight/output tiles + resident LHS/bias, doubled + slack,
    # clamped to stay inside v7x's 64 MiB physical VMEM.
    vmem_needed = (2 * E * tile_v * dsize + 2 * B * tile_v * 4
                   + 2 * B * E * dsize + 2 * num_tiles * tile_v * 4)
    vmem_limit = int(min(48 << 20, max(16 << 20, 2 * vmem_needed + (8 << 20))))

    cost = pl.CostEstimate(
        flops=2 * B * E * V_pad,
        transcendentals=0,
        bytes_accessed=(E * V_pad * dsize + B * E * dsize
                        + V_pad * 4 + B * V_pad * 4))

    out = pl.pallas_call(
        cbow_kernel,
        out_shape=jax.ShapeDtypeStruct((B, V_pad), jnp.float32),
        grid_spec=pltpu.PrefetchScalarGridSpec(
            num_scalar_prefetch=0,
            grid=(num_tiles,),
            in_specs=[
                pl.BlockSpec((B, E), lambda j: (0, 0)),               # resident LHS
                pl.BlockSpec((E, tile_v), lambda j: (0, j)),          # weight tile
                pl.BlockSpec((num_tiles, tile_v), lambda j: (0, 0)),  # resident bias
            ],
            out_specs=pl.BlockSpec((B, tile_v), lambda j: (0, j)),
        ),
        compiler_params=pltpu.CompilerParams(
            dimension_semantics=("parallel",),     # v7x: shard vocab tiles over 2 TCs
            vmem_limit_bytes=vmem_limit),
        cost_estimate=cost,
    )(summed, w_c, bias_tiles)

    return out[:, :V] if pad else out


if __name__ == "__main__":
    # Small deterministic problem: batch=8, context window=4, vocab=4096.
    # The tile picker gives tile_v=1024 -> grid=(4,) (>=2 steps per v7x core).
    B, C, V, E = 8, 4, 4096, EMBEDDING_SIZE

    key = jax.random.PRNGKey(0)
    k_idx, k_emb, k_w, k_b = jax.random.split(key, 4)

    x_idx = jax.random.randint(k_idx, (B, C), 0, V, dtype=jnp.int32)
    emb_table = jax.random.normal(k_emb, (V, E), dtype=jnp.float32) * 0.1
    # PyTorch nn.Linear weight is (V, E); we keep the transposed (E, V) layout.
    w_t = jax.random.normal(k_w, (E, V), dtype=jnp.float32) * 0.05
    bias = jax.random.normal(k_b, (V,), dtype=jnp.float32) * 0.01

    out = jax.block_until_ready(cbow_forward(x_idx, emb_table, w_t, bias))
    assert out.shape == (B, V)

    summed_f32 = jnp.sum(emb_table[x_idx], axis=1)

    # Reference 1: identical dtype path (bf16 stream, f32 accumulation) — tight.
    ref_same = (jnp.dot(summed_f32.astype(jnp.bfloat16), w_t.astype(jnp.bfloat16),
                        preferred_element_type=jnp.float32) + bias)
    assert np.allclose(np.asarray(out), np.asarray(ref_same), atol=5e-3, rtol=5e-3)

    # Reference 2: full-f32 PyTorch-equivalent forward — loose (bf16 streaming).
    ref_f32 = summed_f32 @ w_t + bias
    assert np.allclose(np.asarray(out), np.asarray(ref_f32), atol=3e-2, rtol=3e-2)

    print("KERNEL_OK")
</pallas_src>

<mosaic_0001>
module attributes {stable_mosaic.version = 11 : i64} {
  func.func @cbow_kernel(%arg0: i32, %arg1: memref<8x200xbf16, #tpu.memory_space<vmem>>, %arg2: memref<200x1024xbf16, #tpu.memory_space<vmem>>, %arg3: memref<4x1024xf32, #tpu.memory_space<vmem>>, %arg4: memref<8x1024xf32, #tpu.memory_space<vmem>>) attributes {dimension_semantics = [#tpu.dimension_semantics<parallel>], iteration_bounds = array<i64: 4>, scalar_prefetch = 0 : i64, scratch_operands = 0 : i64, tpu.core_type = #tpu.core_type<tc>, window_params = [{pipeline_mode = #tpu.pipeline_mode<synchronous>, transform_indices = @transform_0, window_bounds = array<i64: 8, 200>}, {transform_indices = @transform_1, window_bounds = array<i64: 200, 1024>}, {pipeline_mode = #tpu.pipeline_mode<synchronous>, transform_indices = @transform_2, window_bounds = array<i64: 4, 1024>}, {transform_indices = @transform_3, window_bounds = array<i64: 8, 1024>}]} {
    %c0 = arith.constant 0 : index
    %c0_0 = arith.constant 0 : index
    %0 = vector.load %arg1[%c0, %c0_0] : memref<8x200xbf16, #tpu.memory_space<vmem>>, vector<8x200xbf16>
    %c0_1 = arith.constant 0 : index
    %c0_2 = arith.constant 0 : index
    %1 = vector.load %arg2[%c0_1, %c0_2] : memref<200x1024xbf16, #tpu.memory_space<vmem>>, vector<200x1024xbf16>
    %cst = arith.constant dense<0.000000e+00> : vector<8x1024xf32>
    %2 = tpu.matmul %0, %1, %cst {dimension_numbers = #tpu.dot_dimension_numbers<[1], [0], [0], [1], [0, 0, 1, 1], [], []>} : vector<8x200xbf16>, vector<200x1024xbf16>, vector<8x1024xf32> -> vector<8x1024xf32>
    %3 = arith.index_cast %arg0 : i32 to index
    %c0_3 = arith.constant 0 : index
    %4 = vector.load %arg3[%3, %c0_3] : memref<4x1024xf32, #tpu.memory_space<vmem>>, vector<1x1024xf32>
    %5 = vector.broadcast %4 : vector<1x1024xf32> to vector<8x1024xf32>
    %6 = arith.addf %2, %5 : vector<8x1024xf32>
    %c0_4 = arith.constant 0 : index
    %c0_5 = arith.constant 0 : index
    %7 = vector.load %arg4[%c0_4, %c0_5] : memref<8x1024xf32, #tpu.memory_space<vmem>>, vector<8x1024xf32>
    tpu.vector_store %arg4[%c0_4, %c0_5], %6 {strides = array<i32>} : memref<8x1024xf32, #tpu.memory_space<vmem>>, vector<8x1024xf32>,
    return
  }
  func.func @transform_0(%arg0: i32) -> (i32, i32) {
    %c0_i32 = arith.constant 0 : i32
    %c0_i32_0 = arith.constant 0 : i32
    %c0_i32_1 = arith.constant 0 : i32
    return %c0_i32, %c0_i32_0 : i32, i32
  }
  func.func @transform_1(%arg0: i32) -> (i32, i32) {
    %c0_i32 = arith.constant 0 : i32
    %c0_i32_0 = arith.constant 0 : i32
    return %c0_i32, %arg0 : i32, i32
  }
  func.func @transform_2(%arg0: i32) -> (i32, i32) {
    %c0_i32 = arith.constant 0 : i32
    %c0_i32_0 = arith.constant 0 : i32
    %c0_i32_1 = arith.constant 0 : i32
    return %c0_i32, %c0_i32_0 : i32, i32
  }
  func.func @transform_3(%arg0: i32) -> (i32, i32) {
    %c0_i32 = arith.constant 0 : i32
    %c0_i32_0 = arith.constant 0 : i32
    return %c0_i32, %arg0 : i32, i32
  }
}

</mosaic_0001>

<bundles_post_ra>
// kernel: tpu_custom_call.1
= control target key start
LH: loop header
LB: loop body
LE: loop exit
PB: predicated region body
PF: predicated region fallthrough
CT: control target
= control target key end

     0   :  { %8 = vsyncpa [#allocation3], 0  ;;  %s1968_s0 = inlined_call_operand.hbm [shape: bf16[8,200], index: 0, kind: input, shape index: {}]   ;;  %s1969_s1 = inlined_call_operand.hbm [shape: bf16[200,4096], index: 1, kind: input, shape index: {}]   ;;  %s1970_s2 = inlined_call_operand.hbm [shape: f32[4,1024], index: 2, kind: input, shape index: {}]   ;;  %s1971_s3 = inlined_call_operand.hbm [shape: f32[8,4096], index: 3, kind: output, shape index: {}]  }
   0x1   :  { %9 = vsyncpa [#allocation6], 0 }
   0x2   :  { %11 = vsyncpa [#allocation6 + $0x1], 0 }
   0x3   :  { %12 = vsyncpa [#allocation4], 0 }
   0x4   :  { %14 = vsyncpa [#allocation4 + $0x1], 0  ;;  %s1590_s12 = smov 0   ;;  %s1592_s13 = smov 0  }
   0x5   :  { %s1594_s14 = smov 0   ;;  %s1596_s15 = smov 0  }
   0x6 LB: > { %s1611_s16 = sadd.s32 4294967295, %s1561_s15   ;;  %s1184_s17 = sadd.s32 4294967294, %s1561_s15   ;;  %s1561_s15 = sphi %s1596_s15, %s1996_s15   ;;  %s1557_s14 = sphi %s1594_s14, %s1995_s14   ;;  %s1553_s13 = sphi %s1592_s13, %s1994_s13   ;;  %s1549_s12 = sphi %s1590_s12, %s1993_s12  }
   0x7   : > { %s1615_s18 = sadd.s32 1, %s1561_s15   ;;  %s48_s19 = sadd.s32 1, %s1557_s14 }
   0x8   : > { %s45_s20 = ssub.s32 %s1561_s15, %s1615_s18  ;;  %p55_p0 = scmp.ne.s32.totalorder %s1557_s14, %s1553_s13 }
   0x9   : > { %p46_p1 = scmp.eq.s32.totalorder %s45_s20, 0  ;;  %p56_p2 = scmp.eq.s32.totalorder %s1561_s15, 0 }
   0xa   : > { %p61_p3 = scmp.ne.s32.totalorder %s1553_s13, %s1549_s12  ;;  %p1972_p4 = scmp.eq.s32.totalorder %s1611_s16, 0 }
   0xb   : > { %s1627_s21 = scalar_select %p46_p1, %s1557_s14, %s48_s19  }
   0xc   : > { %p1629_p5 = por %p56_p2, %p55_p0  ;;  %p1635_p6 = por %p1972_p4, %p61_p3 }
   0xd   : > { %p106_p7 = scmp.eq.s32.totalorder %s1611_s16, 3  ;;  %p112_p8 = scmp.eq.s32.totalorder %s1184_s17, 3 }
   0xe   : > { %s1978_s23 = scalar_select %p1635_p6, 1, 0 }
   0xf   : > { %p1185_p9 = scmp.ge.s32.totalorder %s1561_s15, 1  ;;  %p119_p10 = scmp.lt.s32.totalorder %s1561_s15, 5 }
  0x10   : > { %p1642_p11 = por %p106_p7, %p55_p0  ;;  %p1646_p12 = por %p112_p8, %p61_p3 }
  0x11   : > { %p1650_p13 = pnand %p1185_p9, %p119_p10  ;;  %s1563_s27 = smov [#allocation7]  }
  0x12   : > { %s1979_s24 = scalar_select %p1642_p11, 1, 0 }
  0x13   : > { %s1980_s25 = scalar_select %p1646_p12, 1, 0 }
  0x14   : > { %s1981_s26 = scalar_select %p1650_p13, 1, 0 }
  0x15   : > { %p1333_p1 = pneg %p1650_p13  ;;  %s143_s28 = sshll.u32 %s1563_s27, 4  ;;  %s144_s28 = int_to_ptr.vmem [resolvable:$true] %s143_s28 }
  0x16   : > { %p1350_p2 = scmp.lt.s32.totalorder %s1561_s15, 4  ;;  %s1564_s4 = smov [#allocation2]  }
  0x17   : > { %p1659_p0 = pnand %p1333_p1, %p1972_p4  ;;  %s132_s5 = sshll.u32 %s1564_s4, 4  ;;  %s1669_s5 = int_to_ptr.vmem [resolvable:$true] %s132_s5 }
  0x18   : > { %p1665_p3 = pnand %p1350_p2, %p1629_p5  ;;  %s1401_s8 = scalar_lea.hbm %s1970_s2, 512 }
  0x19   : > { %p1402_p7 = scmp.ne.s32.totalorder %s1970_s2, %s1401_s8  ;;  %p1403_p8 = pneg %p1659_p0 }
  0x1a   : > { %s1983_s30 = scalar_select %p1665_p3, 1, 0 }
  0x1b   : > { %p1404_p5 = pnand %p1403_p8, %p1402_p7  ;;  %p1408_p10 = scmp.lt.u32.totalorder %s1401_s8, %s1970_s2 }
  0x1d   : > { %p1405_p9 = pneg %p1404_p5 }
  0x1f   : > { %p1410_p1 = pnand %p1408_p10, %p1405_p9 }
  0x21   : > { %1413 = shalt.err (!%p1410_p1)
}
  0x22   : > { %s1414_s19 = scalar_lea.vmem %s144_s28, 512  ;;  %p1422_p11 = scmp.lt.s32.totalorder %s144_s28, %s144_s28 }
  0x23   : > { %p1415_p2 = scmp.ne.s32.totalorder %s144_s28, %s1414_s19  ;;  %p1423_p6 = scmp.lt.s32.totalorder %s1414_s19, %s1414_s19 }
  0x25   : > { %p1417_p4 = pnand %p1415_p2, %p1403_p8  ;;  %p1424_p13 = por %p1423_p6, %p1422_p11 }
  0x27   : > { %p1418_p12 = pneg %p1417_p4 }
  0x29   : > { %p1425_p3 = pnand %p1424_p13, %p1418_p12 }
  0x2b   : > { %1428 = shalt.err (!%p1425_p3)
}
  0x2c   : > { %1339 = dma.hbm_to_vmem [thread:$0]  (!%p1659_p0), %s1970_s2, 512, %s144_s28, [#allocation6]  }
  0x2d   : > { %s154_s27 = sand.u32 1, %s1561_s15   ;;  %s1429_s7 = scalar_lea.hbm %s1968_s0, 128 }
  0x2e   : > { %p1430_p4 = scmp.ne.s32.totalorder %s1968_s0, %s1429_s7  ;;  %p1436_p12 = scmp.lt.u32.totalorder %s1429_s7, %s1968_s0 }
  0x30   : > { %p1432_p6 = pnand %p1430_p4, %p1403_p8 }
  0x32   : > { %p1433_p11 = pneg %p1432_p6 }
  0x34   : > { %p1438_p13 = pnand %p1436_p12, %p1433_p11 }
  0x36   : > { %1441 = shalt.err (!%p1438_p13)
}
  0x37   : > { %s1442_s28 = scalar_lea.vmem %s1669_s5, 128  ;;  %p1450_p9 = scmp.lt.s32.totalorder %s1669_s5, %s1669_s5 }
  0x38   : > { %p1443_p3 = scmp.ne.s32.totalorder %s1669_s5, %s1442_s28  ;;  %p1451_p10 = scmp.lt.s32.totalorder %s1442_s28, %s1442_s28 }
  0x3a   : > { %p1445_p7 = pnand %p1443_p3, %p1403_p8  ;;  %p1452_p1 = por %p1451_p10, %p1450_p9 }
  0x3c   : > { %p1446_p5 = pneg %p1445_p7 }
  0x3e   : > { %p1453_p2 = pnand %p1452_p1, %p1446_p5 }
  0x40   : > { %1456 = shalt.err (!%p1453_p2)
}
  0x41   : > { %1336 = dma.hbm_to_vmem [thread:$0]  (!%p1659_p0), %s1968_s0, 128, %s1669_s5, [#allocation3]  }
  0x42   : > { %s156_s20 = sand.u32 1, %s1557_s14   ;;  %s1316_s4 = sshll.u32 %s1561_s15, 9 }
  0x43   : > { %s1319_s22 = smul.u32 800, %s156_s20  ;;  %s1724_s8 = scalar_lea.hbm %s1969_s1, %s1316_s4 }
  0x44   : > { %s1728_s10 = scalar_lea.sflag [#allocation6], %s154_s27  ;;  %s1457_s11 = scalar_lea.hbm %s1724_s8, 12800 }
  0x45   : > { %s158_s29 = scalar_lea.vmem [#allocation5], %s1319_s22  ;;  %p1458_p0 = scmp.ne.s32.totalorder %s1724_s8, %s1457_s11 }
  0x46   : > { %s165_s9 = sshll.u32 %s158_s29, 4  ;;  %p1984_p8 = scmp.ne.s32.totalorder %s1983_s30, 0  ;;  %s1726_s9 = int_to_ptr.vmem [resolvable:$true] %s165_s9 }
  0x47   : > { %s1462_s17 = scalar_lea.hbm %s1969_s1, 51200  ;;  %p1463_p12 = scmp.lt.u32.totalorder %s1724_s8, %s1969_s1 }
  0x48   : > { %p1459_p4 = pneg %p1984_p8  ;;  %p1464_p13 = scmp.lt.u32.totalorder %s1462_s17, %s1457_s11 }
  0x49   : > { %p1466_p7 = scmp.lt.u32.totalorder %s1457_s11, %s1724_s8 }
  0x4a   : > { %p1460_p6 = pnand %p1459_p4, %p1458_p0  ;;  %p1465_p3 = por %p1464_p13, %p1463_p12 }
  0x4c   : > { %p1461_p11 = pneg %p1460_p6  ;;  %p1467_p5 = por %p1466_p7, %p1465_p3 }
  0x4e   : > { %p1468_p9 = pnand %p1467_p5, %p1461_p11 }
  0x50   : > { %1471 = shalt.err (!%p1468_p9)
}
  0x51   : > { %s1472_s27 = scalar_lea.vmem %s1726_s9, 12800  ;;  %s1565_s22 = smov [#allocation5]  }
  0x52   : > { %p1473_p10 = scmp.ne.s32.totalorder %s1726_s9, %s1472_s27  ;;  %s1477_s4 = sshll.u32 %s1565_s22, 4  ;;  %s1478_s4 = int_to_ptr.vmem [resolvable:$false] %s1477_s4 }
  0x53   : > { %s1479_s6 = scalar_lea.vmem %s1478_s4, 25600  ;;  %p1480_p0 = scmp.lt.s32.totalorder %s1726_s9, %s1478_s4 }
  0x54   : > { %p1475_p1 = pnand %p1473_p10, %p1459_p4  ;;  %p1481_p6 = scmp.lt.s32.totalorder %s1479_s6, %s1472_s27 }
  0x56   : > { %p1476_p2 = pneg %p1475_p1  ;;  %p1482_p12 = por %p1481_p6, %p1480_p0 }
  0x58   : > { %p1483_p13 = pnand %p1482_p12, %p1476_p2 }
  0x5a   : > { %1486 = shalt.err (!%p1483_p13)
}
  0x5b   : > { %s1566_s7 = smov 2048   ;;  %s1567_s29 = smov 512  }
  0x5c   : > { %s1568_s11 = smov 32   ;;  %p1985_p4 = scmp.ne.s32.totalorder %s1981_s26, 0 }
  0x5d   : > { %1343 = dma.hbm_to_vmem [thread:$0]  (!%p1984_p8), %s1724_s8, 12800, %s1726_s9, %s1728_s10, %s1566_s7, %s1567_s29, %s1568_s11  }
  0x5e   : > { %177 = sbr.rel (%p1985_p4) target bundleno = 447 (0x1bf), region = 32  ;;  %p1986_p11 = scmp.eq.s32.totalorder (!%p1985_p4), %s1611_s16, 0 }
  0x65   : > { %1532 = dma.done.wait (%p1986_p11), [#allocation3], 128   ;;  %p1987_p3 = pmov %p1986_p11 }
  0x66   : > { %s183_s5 = sand.u32 1, %s1611_s16   ;;  %s1764_s28 = sand.u32 1, %s1553_s13  }
  0x67   : > { %1534 = vsyncadd (%p1987_p3), [#allocation3], 4294967168  ;;  %s1320_s17 = smul.u32 800, %s1764_s28  ;;  %s184_s19 = scalar_lea.sflag [#allocation6], %s183_s5 }
  0x68   : > { %p1988_p8 = scmp.ne.s32.totalorder %s1978_s23, 0 }
  0x69   : > { %s1767_s30 = scalar_lea.vmem [#allocation5], %s1320_s17 }
  0x6a   : > { %1536 = dma.done.wait (%p1988_p8), %s184_s19, 12800  }
  0x6b   : > { %1538 = vsyncadd (%p1988_p8), %s184_s19, 4294954496  ;;  %p1989_p7 = pmov %p1987_p3 }
  0x6c   : > { %p1990_p5 = pmov %p1987_p3 }
  0x6d   : > { %1540 = dma.done.wait (%p1989_p7), [#allocation6], 512  }
  0x6e   : > { %1542 = vsyncadd (%p1990_p5), [#allocation6], 4294966784  ;;  %v218_v0 = vld [vmem:[%s1767_s30] sm:$0xff]  ;;  %v219_v2 = vld [vmem:[%s1767_s30 + $0x8] sm:$0xff]  ;;  %vm874_vm0 = vcmask 588800   ;;  %vm878_vm1 = vcmask 1043456  }
  0x6f   : > { %v222_v1 = vld [vmem:[%s1767_s30 + $0x20] sm:$0xff]  ;;  %v223_v4 = vld [vmem:[%s1767_s30 + $0x28] sm:$0xff]  ;;  %v1801_v43 = vld [vmem:[#allocation2] sm:$0xff]  ;;  %s318_s23 = sshra.s32 %s1611_s16, 2  ;;  %s321_s26 = sand.u32 3, %s1611_s16 }
  0x70   : > { %v1200_v3 = vcombine.high %v218_v0, %v222_v1  ;;  %v1199_v5 = vcombine.low %v218_v0, %v222_v1  ;;  %v226_v6 = vld [vmem:[%s1767_s30 + $0x40] sm:$0xff]  ;;  %v1202_v8 = vcombine.high %v219_v2, %v223_v4  ;;  %v1201_v9 = vcombine.low %v219_v2, %v223_v4  ;;  %v227_v11 = vld [vmem:[%s1767_s30 + $0x48] sm:$0xff]  ;;  %s1317_s8 = sshll.u32 %s318_s23, 5  ;;  %s1194_s20 = sshll.u32 %s1764_s28, 6 }
  0x71   : > { %v230_v7 = vld [vmem:[%s1767_s30 + $0x60] sm:$0xff]  ;;  %v231_v12 = vld [vmem:[%s1767_s30 + $0x68] sm:$0xff]  ;;  %v1807_v49 = vcombine.high %v1801_v43, %v1801_v43  ;;  %s324_s9 = sadd.s32 %s1317_s8, %s321_s26  ;;  %s1910_s27 = scalar_lea.vmem [#allocation8], %s1194_s20 }
  0x72   : > { %v1208_v10 = vcombine.high %v226_v6, %v230_v7  ;;  %v234_v13 = vld [vmem:[%s1767_s30 + $0x80] sm:$0xff]  ;;  %903 = vmatprep.subr.bf16.mxu0 %v1200_v3  ;;  %v1210_v14 = vcombine.high %v227_v11, %v231_v12  ;;  %v235_v16 = vld [vmem:[%s1767_s30 + $0x88] sm:$0xff]  ;;  %944 = vmatprep.subr.bf16.mxu1 %v1202_v8  ;;  %v1207_v18 = vcombine.low %v226_v6, %v230_v7  ;;  %s325_s10 = scalar_lea.vmem [#allocation7], %s324_s9  ;;  %s1318_s22 = sshll.u32 %s1611_s16, 10 }
  0x73   : > { %v238_v15 = vld [vmem:[%s1767_s30 + $0xa0] sm:$0xff]  ;;  %v239_v17 = vld [vmem:[%s1767_s30 + $0xa8] sm:$0xff]  ;;  %904 = vmatpush1.bf16.msra.mxu0 %v1199_v5  ;;  %945 = vmatpush1.bf16.msra.mxu1 %v1201_v9  ;;  %v1209_v19 = vcombine.low %v227_v11, %v231_v12  ;;  %s1090_s4 = sshll.u32 %s1910_s27, 4  ;;  %s1922_s16 = scalar_lea.hbm %s1971_s3, %s1318_s22  ;;  %s1924_s4 = int_to_ptr.vmem [resolvable:$true] %s1090_s4 }
  0x74   : > { %905 = vmatprep.subr.bf16.mxu0 %v1208_v10  ;;  %v1216_v20 = vcombine.high %v234_v13, %v238_v15  ;;  %946 = vmatprep.subr.bf16.mxu1 %v1210_v14  ;;  %v1218_v21 = vcombine.high %v235_v16, %v239_v17  ;;  %v242_v22 = vld [vmem:[%s1767_s30 + $0xc0] sm:$0xff]  ;;  %v243_v24 = vld [vmem:[%s1767_s30 + $0xc8] sm:$0xff]  ;;  %v1215_v26 = vcombine.low %v234_v13, %v238_v15  ;;  %s1076_s29 = scalar_lea.sflag [#allocation4], %s1764_s28  ;;  %s1487_s11 = scalar_lea.vmem %s1924_s4, 1024 }
  0x75   : > { %v246_v23 = vld [vmem:[%s1767_s30 + $0xe0] sm:$0xff]  ;;  %v247_v25 = vld [vmem:[%s1767_s30 + $0xe8] sm:$0xff]  ;;  %v1217_v27 = vcombine.low %v235_v16, %v239_v17  ;;  %1304 = vmatprep.mubr.msk.bf16.mxu0 %vm874_vm0, %v1807_v49  ;;  %1306 = vmatprep.mubr.msk.bf16.mxu1 %vm874_vm0, %v1807_v49  ;;  %p1488_p9 = scmp.ne.s32.totalorder %s1924_s4, %s1487_s11  ;;  %p1991_p10 = scmp.ne.s32.totalorder %s1979_s24, 0 }
  0x76   : > { %v1224_v28 = vcombine.high %v242_v22, %v246_v23  ;;  %v1226_v29 = vcombine.high %v243_v24, %v247_v25  ;;  %v250_v30 = vld [vmem:[%s1767_s30 + $0x100] sm:$0xff]  ;;  %v251_v32 = vld [vmem:[%s1767_s30 + $0x108] sm:$0xff]  ;;  %v1223_v34 = vcombine.low %v242_v22, %v246_v23  ;;  %v1225_v35 = vcombine.low %v243_v24, %v247_v25  ;;  %s1569_s5 = smov [#allocation8]  }
  0x77   : > { %906 = vmatpush1.bf16.msra.mxu0 %v1207_v18  ;;  %947 = vmatpush1.bf16.msra.mxu1 %v1209_v19  ;;  %v254_v31 = vld [vmem:[%s1767_s30 + $0x120] sm:$0xff]  ;;  %v255_v33 = vld [vmem:[%s1767_s30 + $0x128] sm:$0xff]  ;;  %p1489_p1 = pnand %p1488_p9, %p1991_p10  ;;  %s1491_s17 = sshll.u32 %s1569_s5, 4  ;;  %s1492_s17 = int_to_ptr.vmem [resolvable:$false] %s1491_s17 }
  0x78   : > { %907 = vmatprep.subr.bf16.mxu0 %v1216_v20  ;;  %948 = vmatprep.subr.bf16.mxu1 %v1218_v21  ;;  %v1232_v36 = vcombine.high %v250_v30, %v254_v31  ;;  %v1234_v37 = vcombine.high %v251_v32, %v255_v33  ;;  %v258_v38 = vld [vmem:[%s1767_s30 + $0x140] sm:$0xff]  ;;  %v259_v40 = vld [vmem:[%s1767_s30 + $0x148] sm:$0xff]  ;;  %v1231_v42 = vcombine.low %v250_v30, %v254_v31  ;;  %s1493_s19 = scalar_lea.vmem %s1492_s17, 2048  ;;  %p1494_p0 = scmp.lt.s32.totalorder %s1924_s4, %s1492_s17 }
  0x79   : > { %v262_v39 = vld [vmem:[%s1767_s30 + $0x160] sm:$0xff]  ;;  %v263_v41 = vld [vmem:[%s1767_s30 + $0x168] sm:$0xff]  ;;  %v1233_v44 = vcombine.low %v251_v32, %v255_v33  ;;  %p1490_p2 = pneg %p1489_p1  ;;  %p1495_p6 = scmp.lt.s32.totalorder %s1493_s19, %s1487_s11 }
  0x7a   : > { %v1240_v45 = vcombine.high %v258_v38, %v262_v39  ;;  %v1242_v46 = vcombine.high %v259_v40, %v263_v41  ;;  %v266_v47 = vld [vmem:[%s1767_s30 + $0x180] sm:$0xff]  ;;  %v267_v50 = vld [vmem:[%s1767_s30 + $0x188] sm:$0xff]  ;;  %v1239_v52 = vcombine.low %v258_v38, %v262_v39  ;;  %v1241_v53 = vcombine.low %v259_v40, %v263_v41  ;;  %v220_v40 = vld [vmem:[%s1767_s30 + $0x10] sm:$0xff] }
  0x7b   : > { %908 = vmatpush1.bf16.msra.mxu0 %v1215_v26  ;;  %949 = vmatpush1.bf16.msra.mxu1 %v1217_v27  ;;  %v270_v48 = vld [vmem:[%s1767_s30 + $0x1a0] sm:$0xff]  ;;  %v271_v51 = vld [vmem:[%s1767_s30 + $0x1a8] sm:$0xff]  ;;  %v224_v41 = vld [vmem:[%s1767_s30 + $0x30] sm:$0xff]  ;;  %p1496_p12 = por %p1495_p6, %p1494_p0 }
  0x7c   : > { %909 = vmatprep.subr.bf16.mxu0 %v1224_v28  ;;  %950 = vmatprep.subr.bf16.mxu1 %v1226_v29  ;;  %v1248_v54 = vcombine.high %v266_v47, %v270_v48  ;;  %v1250_v55 = vcombine.high %v267_v50, %v271_v51  ;;  %v274_v56 = vld [vmem:[%s1767_s30 + $0x1c0] sm:$0xff]  ;;  %v275_v58 = vld [vmem:[%s1767_s30 + $0x1c8] sm:$0xff]  ;;  %v1247_v60 = vcombine.low %v266_v47, %v270_v48 }
  0x7d   : > { %v278_v57 = vld [vmem:[%s1767_s30 + $0x1e0] sm:$0xff]  ;;  %v279_v59 = vld [vmem:[%s1767_s30 + $0x1e8] sm:$0xff]  ;;  %v1249_v61 = vcombine.low %v267_v50, %v271_v51  ;;  %v228_v50 = vld [vmem:[%s1767_s30 + $0x50] sm:$0xff]  ;;  %p1497_p13 = pnand %p1496_p12, %p1490_p2 }
  0x7e   : > { %v1256_v62 = vcombine.high %v274_v56, %v278_v57  ;;  %v1258_v63 = vcombine.high %v275_v58, %v279_v59  ;;  %v282_v0 = vld [vmem:[%s1767_s30 + $0x200] sm:$0xff]  ;;  %v283_v2 = vld [vmem:[%s1767_s30 + $0x208] sm:$0xff]  ;;  %v1255_v4 = vcombine.low %v274_v56, %v278_v57  ;;  %v1257_v5 = vcombine.low %v275_v58, %v279_v59  ;;  %v232_v51 = vld [vmem:[%s1767_s30 + $0x70] sm:$0xff] }
  0x7f   : > { %910 = vmatpush1.bf16.msra.mxu0 %v1223_v34  ;;  %951 = vmatpush1.bf16.msra.mxu1 %v1225_v35  ;;  %v286_v1 = vld [vmem:[%s1767_s30 + $0x220] sm:$0xff]  ;;  %v287_v3 = vld [vmem:[%s1767_s30 + $0x228] sm:$0xff]  ;;  %v1212_v57 = vcombine.high %v228_v50, %v232_v51  ;;  %v236_v59 = vld [vmem:[%s1767_s30 + $0x90] sm:$0xff] }
  0x80   : > { %911 = vmatprep.subr.bf16.mxu0 %v1232_v36  ;;  %952 = vmatprep.subr.bf16.mxu1 %v1234_v37  ;;  %v1264_v6 = vcombine.high %v282_v0, %v286_v1  ;;  %v1266_v7 = vcombine.high %v283_v2, %v287_v3  ;;  %v290_v8 = vld [vmem:[%s1767_s30 + $0x240] sm:$0xff]  ;;  %v291_v10 = vld [vmem:[%s1767_s30 + $0x248] sm:$0xff]  ;;  %v1263_v12 = vcombine.low %v282_v0, %v286_v1 }
  0x81   : > { %v294_v9 = vld [vmem:[%s1767_s30 + $0x260] sm:$0xff]  ;;  %v295_v11 = vld [vmem:[%s1767_s30 + $0x268] sm:$0xff]  ;;  %v1265_v13 = vcombine.low %v283_v2, %v287_v3  ;;  %v244_v2 = vld [vmem:[%s1767_s30 + $0xd0] sm:$0xff] }
  0x82   : > { %v1272_v14 = vcombine.high %v290_v8, %v294_v9  ;;  %v1274_v15 = vcombine.high %v291_v10, %v295_v11  ;;  %v298_v16 = vld [vmem:[%s1767_s30 + $0x280] sm:$0xff]  ;;  %v299_v18 = vld [vmem:[%s1767_s30 + $0x288] sm:$0xff]  ;;  %v1271_v20 = vcombine.low %v290_v8, %v294_v9  ;;  %v1273_v21 = vcombine.low %v291_v10, %v295_v11  ;;  %v248_v3 = vld [vmem:[%s1767_s30 + $0xf0] sm:$0xff] }
  0x83   : > { %912 = vmatpush1.bf16.msra.mxu0 %v1231_v42  ;;  %953 = vmatpush1.bf16.msra.mxu1 %v1233_v44  ;;  %v302_v17 = vld [vmem:[%s1767_s30 + $0x2a0] sm:$0xff]  ;;  %v303_v19 = vld [vmem:[%s1767_s30 + $0x2a8] sm:$0xff]  ;;  %v221_v42 = vld [vmem:[%s1767_s30 + $0x18] sm:$0xff]  ;;  %v1228_v8 = vcombine.high %v244_v2, %v248_v3 }
  0x84   : > { %913 = vmatprep.subr.bf16.mxu0 %v1240_v45  ;;  %954 = vmatprep.subr.bf16.mxu1 %v1242_v46  ;;  %v1280_v22 = vcombine.high %v298_v16, %v302_v17  ;;  %v1282_v23 = vcombine.high %v299_v18, %v303_v19  ;;  %v306_v24 = vld [vmem:[%s1767_s30 + $0x2c0] sm:$0xff]  ;;  %v307_v26 = vld [vmem:[%s1767_s30 + $0x2c8] sm:$0xff]  ;;  %v1279_v28 = vcombine.low %v298_v16, %v302_v17  ;;  %v225_v44 = vld [vmem:[%s1767_s30 + $0x38] sm:$0xff] }
  0x85   : > { %v310_v25 = vld [vmem:[%s1767_s30 + $0x2e0] sm:$0xff]  ;;  %v311_v27 = vld [vmem:[%s1767_s30 + $0x2e8] sm:$0xff]  ;;  %v1281_v29 = vcombine.low %v299_v18, %v303_v19  ;;  %v1204_v46 = vcombine.high %v220_v40, %v224_v41  ;;  %v1206_v48 = vcombine.high %v221_v42, %v225_v44  ;;  %v1205_v56 = vcombine.low %v221_v42, %v225_v44  ;;  %v252_v10 = vld [vmem:[%s1767_s30 + $0x110] sm:$0xff] }
  0x86   : > { %v1288_v30 = vcombine.high %v306_v24, %v310_v25  ;;  %v1290_v31 = vcombine.high %v307_v26, %v311_v27  ;;  %v314_v32 = vld [vmem:[%s1767_s30 + $0x300] sm:$0xff]  ;;  %v315_v33 = vld [vmem:[%s1767_s30 + $0x308] sm:$0xff]  ;;  %v1287_v34 = vcombine.low %v306_v24, %v310_v25  ;;  %v1289_v35 = vcombine.low %v307_v26, %v311_v27  ;;  %v256_v11 = vld [vmem:[%s1767_s30 + $0x130] sm:$0xff] }
  0x87   : > { %914 = vmatpush1.bf16.msra.mxu0 %v1239_v52  ;;  %955 = vmatpush1.bf16.msra.mxu1 %v1241_v53  ;;  %v1296_v36 = vcombine.high %v314_v32, %v314_v32  ;;  %v1295_v37 = vcombine.low %v314_v32, %v314_v32  ;;  %v1298_v38 = vcombine.high %v315_v33, %v315_v33  ;;  %v229_v53 = vld [vmem:[%s1767_s30 + $0x58] sm:$0xff]  ;;  %v260_v17 = vld [vmem:[%s1767_s30 + $0x150] sm:$0xff] }
  0x88   : > { %915 = vmatprep.subr.bf16.mxu0 %v1248_v54  ;;  %956 = vmatprep.subr.bf16.mxu1 %v1250_v55  ;;  %v1297_v39 = vcombine.low %v315_v33, %v315_v33  ;;  %v1849_v52 = vcombine.low %v1801_v43, %v1801_v43  ;;  %v233_v54 = vld [vmem:[%s1767_s30 + $0x78] sm:$0xff]  ;;  %v1203_v55 = vcombine.low %v220_v40, %v224_v41  ;;  %v264_v18 = vld [vmem:[%s1767_s30 + $0x170] sm:$0xff] }
  0x89   : > { %v880_v45 = vsel %vm878_vm1, %v1295_v37, 0  ;;  %v1214_v58 = vcombine.high %v229_v53, %v233_v54  ;;  %v237_v43 = vld [vmem:[%s1767_s30 + $0x98] sm:$0xff]  ;;  %v268_v25 = vld [vmem:[%s1767_s30 + $0x190] sm:$0xff] }
  0x8a   : > { %v886_v47 = vsel %vm878_vm1, %v1297_v39, 0  ;;  %v261_v19 = vld [vmem:[%s1767_s30 + $0x158] sm:$0xff]  ;;  %v272_v26 = vld [vmem:[%s1767_s30 + $0x1b0] sm:$0xff] }
  0x8b   : > { %916 = vmatpush1.bf16.msra.mxu0 %v1247_v60  ;;  %957 = vmatpush1.bf16.msra.mxu1 %v1249_v61  ;;  %v240_v60 = vld [vmem:[%s1767_s30 + $0xb0] sm:$0xff]  ;;  %v241_v61 = vld [vmem:[%s1767_s30 + $0xb8] sm:$0xff]  ;;  %v1251_v37 = vcombine.low %v268_v25, %v272_v26 }
  0x8c   : > { %917 = vmatprep.subr.bf16.mxu0 %v1256_v62  ;;  %958 = vmatprep.subr.bf16.mxu1 %v1258_v63  ;;  %v1211_v62 = vcombine.low %v228_v50, %v232_v51  ;;  %v1213_v63 = vcombine.low %v229_v53, %v233_v54  ;;  %v1220_v0 = vcombine.high %v236_v59, %v240_v60  ;;  %v269_v27 = vld [vmem:[%s1767_s30 + $0x198] sm:$0xff]  ;;  %v276_v33 = vld [vmem:[%s1767_s30 + $0x1d0] sm:$0xff] }
  0x8d   : > { %v1222_v1 = vcombine.high %v237_v43, %v241_v61  ;;  %v284_v41 = vld [vmem:[%s1767_s30 + $0x210] sm:$0xff]  ;;  %v285_v44 = vld [vmem:[%s1767_s30 + $0x218] sm:$0xff] }
  0x8e   : > { %v288_v42 = vld [vmem:[%s1767_s30 + $0x230] sm:$0xff]  ;;  %v293_v54 = vld [vmem:[%s1767_s30 + $0x258] sm:$0xff] }
  0x8f   : > { %918 = vmatpush1.bf16.msra.mxu0 %v1255_v4  ;;  %959 = vmatpush1.bf16.msra.mxu1 %v1257_v5  ;;  %v245_v4 = vld [vmem:[%s1767_s30 + $0xd8] sm:$0xff]  ;;  %v292_v51 = vld [vmem:[%s1767_s30 + $0x250] sm:$0xff] }
  0x90   : > { %919 = vmatprep.subr.bf16.mxu0 %v1264_v6  ;;  %960 = vmatprep.subr.bf16.mxu1 %v1266_v7  ;;  %v249_v5 = vld [vmem:[%s1767_s30 + $0xf8] sm:$0xff]  ;;  %v1219_v6 = vcombine.low %v236_v59, %v240_v60  ;;  %v1221_v7 = vcombine.low %v237_v43, %v241_v61  ;;  %v296_v53 = vld [vmem:[%s1767_s30 + $0x270] sm:$0xff] }
  0x91   : > { %v1230_v9 = vcombine.high %v245_v4, %v249_v5  ;;  %v300_v60 = vld [vmem:[%s1767_s30 + $0x290] sm:$0xff]  ;;  %v301_v61 = vld [vmem:[%s1767_s30 + $0x298] sm:$0xff] }
  0x92   : > { %v304_v43 = vld [vmem:[%s1767_s30 + $0x2b0] sm:$0xff] }
  0x93   : > { %920 = vmatpush1.bf16.msra.mxu0 %v1263_v12  ;;  %961 = vmatpush1.bf16.msra.mxu1 %v1265_v13  ;;  %v253_v12 = vld [vmem:[%s1767_s30 + $0x118] sm:$0xff] }
  0x94   : > { %921 = vmatprep.subr.bf16.mxu0 %v1272_v14  ;;  %962 = vmatprep.subr.bf16.mxu1 %v1274_v15  ;;  %v257_v13 = vld [vmem:[%s1767_s30 + $0x138] sm:$0xff]  ;;  %v1227_v14 = vcombine.low %v244_v2, %v248_v3  ;;  %v1236_v15 = vcombine.high %v252_v10, %v256_v11  ;;  %v308_v3 = vld [vmem:[%s1767_s30 + $0x2d0] sm:$0xff] }
  0x95   : > { %v1238_v16 = vcombine.high %v253_v12, %v257_v13 }
  0x97   : > { %922 = vmatpush1.bf16.msra.mxu0 %v1271_v20  ;;  %963 = vmatpush1.bf16.msra.mxu1 %v1273_v21  ;;  %v265_v20 = vld [vmem:[%s1767_s30 + $0x178] sm:$0xff]  ;;  %v1235_v21 = vcombine.low %v252_v10, %v256_v11  ;;  %v316_v11 = vld [vmem:[%s1767_s30 + $0x310] sm:$0xff] }
  0x98   : > { %923 = vmatprep.subr.bf16.mxu0 %v1280_v22  ;;  %964 = vmatprep.subr.bf16.mxu1 %v1282_v23  ;;  %v1237_v22 = vcombine.low %v253_v12, %v257_v13  ;;  %v1244_v23 = vcombine.high %v260_v17, %v264_v18  ;;  %v1246_v24 = vcombine.high %v261_v19, %v265_v20  ;;  %v317_v12 = vld [vmem:[%s1767_s30 + $0x318] sm:$0xff] }
  0x9b   : > { %924 = vmatpush1.bf16.msra.mxu0 %v1279_v28  ;;  %965 = vmatpush1.bf16.msra.mxu1 %v1281_v29  ;;  %v273_v28 = vld [vmem:[%s1767_s30 + $0x1b8] sm:$0xff]  ;;  %v1243_v29 = vcombine.low %v260_v17, %v264_v18  ;;  %v1301_v17 = vcombine.low %v317_v12, %v317_v12 }
  0x9c   : > { %925 = vmatprep.subr.bf16.mxu0 %v1288_v30  ;;  %966 = vmatprep.subr.bf16.mxu1 %v1290_v31  ;;  %v1245_v30 = vcombine.low %v261_v19, %v265_v20  ;;  %v1252_v31 = vcombine.high %v268_v25, %v272_v26  ;;  %v1254_v32 = vcombine.high %v269_v27, %v273_v28  ;;  %v328_v20 = vlaneseq }
  0x9d   : > { %v898_v19 = vsel %vm878_vm1, %v1301_v17, 0 }
  0x9f   : > { %926 = vmatpush1.bf16.msra.mxu0 %v1287_v34  ;;  %967 = vmatpush1.bf16.msra.mxu1 %v1289_v35  ;;  %v280_v34 = vld [vmem:[%s1767_s30 + $0x1f0] sm:$0xff]  ;;  %v277_v35 = vld [vmem:[%s1767_s30 + $0x1d8] sm:$0xff] }
  0xa0   : > { %1303 = vmatprep.subr.msk.bf16.mxu0 %vm878_vm1, %v1296_v36  ;;  %1305 = vmatprep.subr.msk.bf16.mxu1 %vm878_vm1, %v1298_v38  ;;  %v281_v36 = vld [vmem:[%s1767_s30 + $0x1f8] sm:$0xff]  ;;  %v1253_v38 = vcombine.low %v269_v27, %v273_v28  ;;  %v1260_v39 = vcombine.high %v276_v33, %v280_v34 }
  0xa1   : > { %v1262_v40 = vcombine.high %v277_v35, %v281_v36 }
  0xa3   : > { %928 = vmatpush1.bf16.msra.mxu0 %v880_v45  ;;  %969 = vmatpush1.bf16.msra.mxu1 %v886_v47  ;;  %v289_v45 = vld [vmem:[%s1767_s30 + $0x238] sm:$0xff]  ;;  %v1261_v47 = vcombine.low %v277_v35, %v281_v36 }
  0xa4   : > { %985 = vmatprep.subr.bf16.mxu0 %v1204_v46  ;;  %1026 = vmatprep.subr.bf16.mxu1 %v1206_v48  ;;  %v1259_v46 = vcombine.low %v276_v33, %v280_v34  ;;  %v1268_v48 = vcombine.high %v284_v41, %v288_v42  ;;  %v1270_v50 = vcombine.high %v285_v44, %v289_v45 }
  0xa6   : > { %936 = vmatmul.mubr.bf16.vlgmr.msra.gmra.mrb[0].mxu0 %v1849_v52  ;;  %977 = vmatmul.mubr.bf16.vlgmr.msra.gmra.mrb[0].mxu1 %v1849_v52 }
  0xa7   : > { %986 = vmatpush1.bf16.msra.mxu0 %v1203_v55  ;;  %1027 = vmatpush1.bf16.msra.mxu1 %v1205_v56  ;;  %v297_v55 = vld [vmem:[%s1767_s30 + $0x278] sm:$0xff]  ;;  %v1267_v56 = vcombine.low %v284_v41, %v288_v42 }
  0xa8   : > { %987 = vmatprep.subr.bf16.mxu0 %v1212_v57  ;;  %1028 = vmatprep.subr.bf16.mxu1 %v1214_v58  ;;  %v1269_v57 = vcombine.low %v285_v44, %v289_v45  ;;  %v1276_v58 = vcombine.high %v292_v51, %v296_v53  ;;  %v1278_v59 = vcombine.high %v293_v54, %v297_v55 }
  0xa9   : > { %1308 = vmatprep.mubr.msk.bf16.mxu0 %vm874_vm0, %v1807_v49  ;;  %1310 = vmatprep.mubr.msk.bf16.mxu1 %vm874_vm0, %v1807_v49  ;;  %v1229_v49 = vcombine.low %v245_v4, %v249_v5  ;;  %v312_v4 = vld [vmem:[%s1767_s30 + $0x2f0] sm:$0xff]  ;;  %v309_v5 = vld [vmem:[%s1767_s30 + $0x2d8] sm:$0xff] }
  0xaa   : > { %v1291_v13 = vcombine.low %v308_v3, %v312_v4 }
  0xab   : > { %988 = vmatpush1.bf16.msra.mxu0 %v1211_v62  ;;  %1029 = vmatpush1.bf16.msra.mxu1 %v1213_v63  ;;  %v305_v62 = vld [vmem:[%s1767_s30 + $0x2b8] sm:$0xff]  ;;  %v1275_v63 = vcombine.low %v292_v51, %v296_v53 }
  0xac   : > { %989 = vmatprep.subr.bf16.mxu0 %v1220_v0  ;;  %1030 = vmatprep.subr.bf16.mxu1 %v1222_v1  ;;  %v1277_v0 = vcombine.low %v293_v54, %v297_v55  ;;  %v1284_v1 = vcombine.high %v300_v60, %v304_v43  ;;  %v1286_v2 = vcombine.high %v301_v61, %v305_v62 }
  0xaf   : > { %990 = vmatpush1.bf16.msra.mxu0 %v1219_v6  ;;  %1031 = vmatpush1.bf16.msra.mxu1 %v1221_v7  ;;  %v313_v6 = vld [vmem:[%s1767_s30 + $0x2f8] sm:$0xff]  ;;  %v1283_v7 = vcombine.low %v300_v60, %v304_v43 }
  0xb0   : > { %991 = vmatprep.subr.bf16.mxu0 %v1228_v8  ;;  %1032 = vmatprep.subr.bf16.mxu1 %v1230_v9  ;;  %v1285_v8 = vcombine.low %v301_v61, %v305_v62  ;;  %v1292_v9 = vcombine.high %v308_v3, %v312_v4  ;;  %v1294_v10 = vcombine.high %v309_v5, %v313_v6 }
  0xb3   : > { %992 = vmatpush1.bf16.msra.mxu0 %v1227_v14  ;;  %1033 = vmatpush1.bf16.msra.mxu1 %v1229_v49  ;;  %v1293_v14 = vcombine.low %v309_v5, %v313_v6  ;;  %v1300_v49 = vcombine.high %v316_v11, %v316_v11 }
  0xb4   : > { %993 = vmatprep.subr.bf16.mxu0 %v1236_v15  ;;  %1034 = vmatprep.subr.bf16.mxu1 %v1238_v16  ;;  %v1299_v15 = vcombine.low %v316_v11, %v316_v11  ;;  %v1302_v16 = vcombine.high %v317_v12, %v317_v12 }
  0xb6   : > { %v892_v18 = vsel %vm878_vm1, %v1299_v15, 0 }
  0xb7   : > { %994 = vmatpush1.bf16.msra.mxu0 %v1235_v21  ;;  %1035 = vmatpush1.bf16.msra.mxu1 %v1237_v22  ;;  %v329_v21 = vshrl.u32 %v328_v20, 7 }
  0xb8   : > { %995 = vmatprep.subr.bf16.mxu0 %v1244_v23  ;;  %1036 = vmatprep.subr.bf16.mxu1 %v1246_v24  ;;  %v326_v23 = vld [vmem:[%s325_s10] ss:$4 sm:$0xff] }
  0xb9   : > { %v330_v22 = vsub.s32 0, %v329_v21  ;;  %v338_v24 = vsub.s32 2, %v329_v21  ;;  %v334_v25 = vsub.s32 1, %v329_v21  ;;  %v342_v26 = vsub.s32 3, %v329_v21 }
  0xba   : > { %v346_v42 = vsub.s32 4, %v329_v21  ;;  %v354_v44 = vsub.s32 6, %v329_v21  ;;  %v350_v45 = vsub.s32 5, %v329_v21 }
  0xbb   : > { %996 = vmatpush1.bf16.msra.mxu0 %v1243_v29  ;;  %1037 = vmatpush1.bf16.msra.mxu1 %v1245_v30  ;;  %v331_v27 = vrot.slane %v326_v23, %v330_v22  ;;  %v339_v28 = vrot.slane %v326_v23, %v338_v24  ;;  %v335_v29 = vrot.slane %v326_v23, %v334_v25 }
  0xbc   : > { %997 = vmatprep.subr.bf16.mxu0 %v1252_v31  ;;  %1038 = vmatprep.subr.bf16.mxu1 %v1254_v32  ;;  %v343_v30 = vrot.slane %v326_v23, %v342_v26 }
  0xbf   : > { %998 = vmatpush1.bf16.msra.mxu0 %v1251_v37  ;;  %1039 = vmatpush1.bf16.msra.mxu1 %v1253_v38 }
  0xc0   : > { %999 = vmatprep.subr.bf16.mxu0 %v1260_v39  ;;  %1040 = vmatprep.subr.bf16.mxu1 %v1262_v40 }
  0xc3   : > { %1000 = vmatpush1.bf16.msra.mxu0 %v1259_v46  ;;  %1041 = vmatpush1.bf16.msra.mxu1 %v1261_v47  ;;  %v358_v46 = vsub.s32 7, %v329_v21  ;;  %v347_v47 = vrot.slane %v326_v23, %v346_v42 }
  0xc4   : > { %1001 = vmatprep.subr.bf16.mxu0 %v1268_v48  ;;  %1042 = vmatprep.subr.bf16.mxu1 %v1270_v50  ;;  %v355_v48 = vrot.slane %v326_v23, %v354_v44  ;;  %v351_v50 = vrot.slane %v326_v23, %v350_v45 }
  0xc5   : > { %v359_v51 = vrot.slane %v326_v23, %v358_v46 }
  0xc7   : > { %1002 = vmatpush1.bf16.msra.mxu0 %v1267_v56  ;;  %1043 = vmatpush1.bf16.msra.mxu1 %v1269_v57 }
  0xc8   : > { %1003 = vmatprep.subr.bf16.mxu0 %v1276_v58  ;;  %1044 = vmatprep.subr.bf16.mxu1 %v1278_v59 }
  0xcb   : > { %1004 = vmatpush1.bf16.msra.mxu0 %v1275_v63  ;;  %1045 = vmatpush1.bf16.msra.mxu1 %v1277_v0 }
  0xcc   : > { %1005 = vmatprep.subr.bf16.mxu0 %v1284_v1  ;;  %1046 = vmatprep.subr.bf16.mxu1 %v1286_v2 }
  0xcf   : > { %1006 = vmatpush1.bf16.msra.mxu0 %v1283_v7  ;;  %1047 = vmatpush1.bf16.msra.mxu1 %v1285_v8 }
  0xd0   : > { %1007 = vmatprep.subr.bf16.mxu0 %v1292_v9  ;;  %1048 = vmatprep.subr.bf16.mxu1 %v1294_v10 }
  0xd3   : > { %1008 = vmatpush1.bf16.msra.mxu0 %v1291_v13  ;;  %1049 = vmatpush1.bf16.msra.mxu1 %v1293_v14 }
  0xd4   : > { %1307 = vmatprep.subr.msk.bf16.mxu0 %vm878_vm1, %v1300_v49  ;;  %1309 = vmatprep.subr.msk.bf16.mxu1 %vm878_vm1, %v1302_v16 }
  0xd7   : > { %1010 = vmatpush1.bf16.msra.mxu0 %v892_v18  ;;  %1051 = vmatpush1.bf16.msra.mxu1 %v898_v19 }
  0xda   : > { %1018 = vmatmul.mubr.bf16.vlgmr.msra.gmra.mrb[4].mxu0 %v1849_v52  ;;  %1059 = vmatmul.mubr.bf16.vlgmr.msra.gmra.mrb[4].mxu1 %v1849_v52 }
 0x179   : > { %v937_v31 = vpop.f32.mrb[0].mxu0  ;;  %v978_v52 = vpop.f32.mrb[0].mxu1 }
 0x17a   : > { %v938_v32 = vadd.f32 %v937_v31, %v331_v27  ;;  %v939_v33 = vpop.f32.mrb[1].mxu0  ;;  %v979_v34 = vadd.f32 %v978_v52, %v339_v28  ;;  %v980_v36 = vpop.f32.mrb[1].mxu1 }
 0x17b   : > { %v940_v35 = vadd.f32 %v939_v33, %v335_v29  ;;  %v941_v37 = vpop.f32.mrb[2].mxu0  ;;  %v981_v38 = vadd.f32 %v980_v36, %v343_v30  ;;  %v982_v39 = vpop.f32.mrb[2].mxu1 }
 0x17c   : > { %1067 = vst [vmem:[%s1910_s27] sm:$0xff] %v938_v32  ;;  %v942_v40 = vpop.f32.mrb[3].mxu0  ;;  %1069 = vst [vmem:[%s1910_s27 + $0x10] sm:$0xff] %v979_v34  ;;  %v983_v41 = vpop.f32.mrb[3].mxu1 }
 0x17d   : > { %1068 = vst [vmem:[%s1910_s27 + $0x8] sm:$0xff] %v940_v35  ;;  %1070 = vst [vmem:[%s1910_s27 + $0x18] sm:$0xff] %v981_v38 }
 0x1ad   : > { %v1019_v53 = vpop.f32.mrb[4].mxu0  ;;  %v1060_v55 = vpop.f32.mrb[4].mxu1 }
 0x1ae   : > { %v1020_v54 = vadd.f32 %v1019_v53, %v347_v47  ;;  %v1021_v56 = vpop.f32.mrb[5].mxu0  ;;  %v1061_v57 = vadd.f32 %v1060_v55, %v355_v48  ;;  %v1062_v59 = vpop.f32.mrb[5].mxu1 }
 0x1af   : > { %v1022_v58 = vadd.f32 %v1021_v56, %v351_v50  ;;  %v1023_v60 = vpop.f32.mrb[6].mxu0  ;;  %v1063_v43 = vadd.f32 %v1062_v59, %v359_v51  ;;  %v1064_v61 = vpop.f32.mrb[6].mxu1 }
 0x1b0   : > { %1071 = vst [vmem:[%s1910_s27 + $0x20] sm:$0xff] %v1020_v54  ;;  %v1024_v62 = vpop.f32.mrb[7].mxu0  ;;  %1073 = vst [vmem:[%s1910_s27 + $0x30] sm:$0xff] %v1061_v57  ;;  %v1065_v63 = vpop.f32.mrb[7].mxu1 }
 0x1b1   : > { %1072 = vst [vmem:[%s1910_s27 + $0x28] sm:$0xff] %v1022_v58  ;;  %1074 = vst [vmem:[%s1910_s27 + $0x38] sm:$0xff] %v1063_v43 }
 0x1b2   : > { %1500 = shalt.err (!%p1497_p13)
}
 0x1b3   : > { %s1501_s28 = scalar_lea.hbm %s1922_s16, 1024  ;;  %s1505_s26 = scalar_lea.hbm %s1971_s3, 4096 }
 0x1b4   : > { %p1502_p4 = scmp.ne.s32.totalorder %s1922_s16, %s1501_s28  ;;  %p1506_p8 = scmp.lt.u32.totalorder %s1922_s16, %s1971_s3 }
 0x1b5   : > { %p1507_p7 = scmp.lt.u32.totalorder %s1505_s26, %s1501_s28  ;;  %p1509_p9 = scmp.lt.u32.totalorder %s1501_s28, %s1922_s16 }
 0x1b6   : > { %p1503_p11 = pnand %p1502_p4, %p1991_p10 }
 0x1b7   : > { %p1508_p5 = por %p1507_p7, %p1506_p8 }
 0x1b8   : > { %p1504_p3 = pneg %p1503_p11 }
 0x1b9   : > { %p1510_p1 = por %p1509_p9, %p1508_p5 }
 0x1bb   : > { %p1511_p2 = pnand %p1510_p1, %p1504_p3 }
 0x1bd   : > { %1514 = shalt.err (!%p1511_p2)
}
 0x1be   : > { %1331 = dma.vmem_to_hbm [thread:$0]  (%p1991_p10), %s1924_s4, 1024, %s1922_s16, %s1076_s29  }
 0x1bf PF: > { %p1353_p0 = scmp.ge.s32.totalorder %s1561_s15, 2  ;;  %s1102_s10 = sand.u32 1, %s1549_s12  }
 0x1c0   : > { %p1992_p6 = scmp.ne.s32.totalorder %s1980_s25, 0  ;;  %s1103_s20 = scalar_lea.sflag [#allocation4], %s1102_s10 }
 0x1c2   : > { %p1345_p12 = pnand %p1353_p0, %p1992_p6 }
 0x1c4   : > { %1544 = dma.done.wait (!%p1345_p12), %s1103_s20, 1024  }
 0x1c5   : > { %1546 = vsyncadd (!%p1345_p12), %s1103_s20, 4294966272  ;;  %p17_p13 = scmp.ge.s32.totalorder %s1615_s18, 6   ;;  %s1993_s12 = smov %s1553_s13 }
 0x1c6   : > { %s1994_s13 = smov %s1557_s14  ;;  %s1995_s14 = smov %s1627_s21 }
 0x1c7   : > { %s1996_s15 = smov %s1615_s18  ;;  %19 = sbr.rel (!%p17_p13) target bundleno = 6 (0x6), region = 87 }
 0x1ce   :  { %1108 = vsyncpa [#allocation3], 1 }
 0x1cf   :  { %1110 = vsyncpa [#allocation3 + $0x1], 1 }
 0x1d0   :  { %1111 = vsyncpa [#allocation6], 1 }
 0x1d1   :  { %1113 = vsyncpa [#allocation6 + $0x1], 1 }
 0x1d2   :  { %1114 = vsyncpa [#allocation4], 1 }
 0x1d3   :  { %1116 = vsyncpa [#allocation4 + $0x1], 1 }

</bundles_post_ra>
